<compile_context>
chip_gen: v5e
topology: v5e:2x2
jax: 0.10.0
libtpu: 0.0.40
codegen_flags: <defaults>
</compile_context>

<pallas_src>
import functools

import jax
import jax.numpy as jnp
from jax import lax
from jax.experimental import pallas as pl
from jax.experimental.pallas import tpu as pltpu


def sinkhorn_kernel(cost_ref, out_ref, *, reg: float, niters: int):
    # (TB, N, N); cast in-kernel so HBM traffic stays in the input dtype.
    cost = cost_ref[...].astype(jnp.float32)
    tb, n, _ = cost.shape

    K = jnp.exp(-reg * cost)                         # the only N^2 EUP pass

    # u indexed by i kept as (TB, N, 1); v indexed by j kept as (TB, 1, N),
    # so broadcasting matches the einsum semantics of the reference:
    #   v_j = 1 / sum_i u_i K_ij    ,    u_i = 1 / sum_j K_ij v_j
    u0 = jnp.full((tb, n, 1), 1.0 / n, dtype=jnp.float32)
    v0 = jnp.full((tb, 1, n), 1.0 / n, dtype=jnp.float32)

    def body(_, carry):
        u, v = carry
        v = 1.0 / jnp.sum(u * K, axis=1, keepdims=True)   # 'ki,kij->kj'
        u = 1.0 / jnp.sum(K * v, axis=2, keepdims=True)   # 'kij,kj->ki'
        return (u, v)

    # niters is a small static constant: fully unroll so K loads / VPU
    # multiplies / XLU reductions co-issue across iteration boundaries.
    u, v = lax.fori_loop(0, niters, body, (u0, v0), unroll=True)

    # log P = log(u_i K_ij v_j) = log u_i - reg * cost_ij + log v_j
    # (2*N vector logs + VPU adds instead of another N^2 EUP pass over P).
    out_ref[...] = ((-reg) * cost + jnp.log(u) + jnp.log(v)).astype(out_ref.dtype)


_VMEM_BUDGET = 40 * 1024 * 1024  # headroom under v7x's 64 MiB physical VMEM


def _step_vmem_bytes(tb: int, n: int) -> int:
    # ~ 2x double-buffered input + 2x output + K + f32 temps, all f32-sized.
    return 6 * tb * n * n * 4


def _choose_tb(batch: int, n: int) -> int:
    """Largest batch-tile that (a) divides B, (b) fits the VMEM budget and
    (c) still leaves >= 2 grid steps when possible so v7x's second
    TensorCore gets work along the 'parallel' batch axis."""
    divisors = [d for d in range(1, batch + 1)
                if batch % d == 0 and _step_vmem_bytes(d, n) <= _VMEM_BUDGET]
    if not divisors:
        return 1
    multi_step = [d for d in divisors if batch // d >= 2]
    return max(multi_step) if multi_step else max(divisors)


def sinkhorn(cost: jax.Array, reg: float = 1.0, niters: int = 10) -> jax.Array:
    """Pallas implementation of Sinkhorn.forward. cost: (B, N, N)."""
    B, N, N2 = cost.shape
    assert N == N2, "cost must be square per batch"

    TB = _choose_tb(B, N)
    grid = (B // TB,)
    kernel = functools.partial(sinkhorn_kernel, reg=float(reg), niters=int(niters))

    step_bytes = _step_vmem_bytes(TB, N)
    vmem_limit = int(min(48 * 1024 * 1024,
                         max(16 * 1024 * 1024, 2 * step_bytes + (2 << 20))))

    # At very large N even a single matrix + double buffers may not fit the
    # v7x 64 MiB VMEM: drop the in/out pipelines to single buffering (the
    # ~niters full-N^2 compute passes per step easily cover the exposed DMA).
    spec_kwargs = {}
    if step_bytes > _VMEM_BUDGET:
        spec_kwargs["pipeline_mode"] = pl.Buffered(1)

    in_spec = pl.BlockSpec((TB, N, N), lambda b: (b, 0, 0), **spec_kwargs)
    out_spec = pl.BlockSpec((TB, N, N), lambda b: (b, 0, 0), **spec_kwargs)

    # NOTE: for N < 128 the trailing dim under-fills the 128-lane vregs and
    # output stores are masked; repacking several matrices along the lane axis
    # would fix that but needs in-kernel relayouts, so it is intentionally not
    # done here to keep lowering robust across N.
    return pl.pallas_call(
        kernel,
        out_shape=jax.ShapeDtypeStruct((B, N, N), jnp.float32),
        grid=grid,
        in_specs=[in_spec],
        out_specs=out_spec,
        compiler_params=pltpu.CompilerParams(
            dimension_semantics=("parallel",),
            vmem_limit_bytes=vmem_limit,
        ),
    )(cost)  # native dtype in; cast to f32 inside the kernel


def sinkhorn_ref(cost: jax.Array, reg: float, niters: int) -> jax.Array:
    """Pure-JAX reference mirroring the PyTorch module."""
    B, N, _ = cost.shape
    K = jnp.exp(-reg * cost.astype(jnp.float32))
    u = jnp.full((B, N), 1.0 / N, dtype=jnp.float32)
    v = jnp.full((B, N), 1.0 / N, dtype=jnp.float32)
    for _ in range(niters):
        v = 1.0 / jnp.einsum('ki,kij->kj', u, K)
        u = 1.0 / jnp.einsum('kij,kj->ki', K, v)
    P = jnp.einsum('ki,kij,kj->kij', u, K, v)
    return jnp.log(P)


if __name__ == "__main__":
    key = jax.random.PRNGKey(0)
    B, N = 2, 16
    reg, niters = 1.0, 10

    # Positive costs (as is typical for cost matrices).
    cost = jax.random.uniform(key, (B, N, N), dtype=jnp.float32,
                              minval=0.1, maxval=2.0)

    out = sinkhorn(cost, reg=reg, niters=niters)
    out = jax.block_until_ready(out)

    ref = sinkhorn_ref(cost, reg, niters)
    assert out.shape == (B, N, N)
    assert jnp.allclose(out, ref, atol=1e-4, rtol=1e-4), (
        f"max abs err = {jnp.max(jnp.abs(out - ref))}")

    print("KERNEL_OK")
</pallas_src>

<mosaic_0001>
module attributes {stable_mosaic.version = 11 : i64} {
  func.func @sinkhorn_kernel(%arg0: i32, %arg1: memref<1x16x16xf32, #tpu.memory_space<vmem>>, %arg2: memref<1x16x16xf32, #tpu.memory_space<vmem>>) attributes {dimension_semantics = [#tpu.dimension_semantics<parallel>], iteration_bounds = array<i64: 2>, scalar_prefetch = 0 : i64, scratch_operands = 0 : i64, tpu.core_type = #tpu.core_type<tc>, window_params = [{transform_indices = @transform_0, window_bounds = array<i64: 1, 16, 16>}, {transform_indices = @transform_1, window_bounds = array<i64: 1, 16, 16>}]} {
    %c0 = arith.constant 0 : index
    %c0_0 = arith.constant 0 : index
    %c0_1 = arith.constant 0 : index
    %0 = vector.load %arg1[%c0, %c0_0, %c0_1] : memref<1x16x16xf32, #tpu.memory_space<vmem>>, vector<1x16x16xf32>
    %cst = arith.constant -1.000000e+00 : f32
    %1 = vector.broadcast %cst : f32 to vector<1x16x16xf32>
    %2 = arith.mulf %1, %0 : vector<1x16x16xf32>
    %3 = math.exp %2 : vector<1x16x16xf32>
    %cst_2 = arith.constant 6.250000e-02 : f32
    %4 = vector.broadcast %cst_2 : f32 to vector<1x16x1xf32>
    %cst_3 = arith.constant 6.250000e-02 : f32
    %5 = vector.broadcast %cst_3 : f32 to vector<1x1x16xf32>
    %c0_i32 = arith.constant 0 : i32
    %6 = vector.broadcast %4 : vector<1x16x1xf32> to vector<1x16x16xf32>
    %7 = arith.mulf %6, %3 : vector<1x16x16xf32>
    %cst_4 = arith.constant dense<0.000000e+00> : vector<1x16xf32>
    %8 = vector.multi_reduction <add>, %7, %cst_4 [1] : vector<1x16x16xf32> to vector<1x16xf32>
    %9 = vector.shape_cast %8 : vector<1x16xf32> to vector<1x1x16xf32>
    %cst_5 = arith.constant 1.000000e+00 : f32
    %10 = vector.broadcast %cst_5 : f32 to vector<1x1x16xf32>
    %11 = arith.divf %10, %9 : vector<1x1x16xf32>
    %12 = vector.broadcast %11 : vector<1x1x16xf32> to vector<1x16x16xf32>
    %13 = arith.mulf %3, %12 : vector<1x16x16xf32>
    %cst_6 = arith.constant dense<0.000000e+00> : vector<1x16xf32>
    %14 = vector.multi_reduction <add>, %13, %cst_6 [2] : vector<1x16x16xf32> to vector<1x16xf32>
    %15 = vector.shape_cast %14 : vector<1x16xf32> to vector<1x16x1xf32>
    %cst_7 = arith.constant 1.000000e+00 : f32
    %16 = vector.broadcast %cst_7 : f32 to vector<1x16x1xf32>
    %17 = arith.divf %16, %15 : vector<1x16x1xf32>
    %c1_i32 = arith.constant 1 : i32
    %18 = vector.broadcast %17 : vector<1x16x1xf32> to vector<1x16x16xf32>
    %19 = arith.mulf %18, %3 : vector<1x16x16xf32>
    %cst_8 = arith.constant dense<0.000000e+00> : vector<1x16xf32>
    %20 = vector.multi_reduction <add>, %19, %cst_8 [1] : vector<1x16x16xf32> to vector<1x16xf32>
    %21 = vector.shape_cast %20 : vector<1x16xf32> to vector<1x1x16xf32>
    %cst_9 = arith.constant 1.000000e+00 : f32
    %22 = vector.broadcast %cst_9 : f32 to vector<1x1x16xf32>
    %23 = arith.divf %22, %21 : vector<1x1x16xf32>
    %24 = vector.broadcast %23 : vector<1x1x16xf32> to vector<1x16x16xf32>
    %25 = arith.mulf %3, %24 : vector<1x16x16xf32>
    %cst_10 = arith.constant dense<0.000000e+00> : vector<1x16xf32>
    %26 = vector.multi_reduction <add>, %25, %cst_10 [2] : vector<1x16x16xf32> to vector<1x16xf32>
    %27 = vector.shape_cast %26 : vector<1x16xf32> to vector<1x16x1xf32>
    %cst_11 = arith.constant 1.000000e+00 : f32
    %28 = vector.broadcast %cst_11 : f32 to vector<1x16x1xf32>
    %29 = arith.divf %28, %27 : vector<1x16x1xf32>
    %c2_i32 = arith.constant 2 : i32
    %30 = vector.broadcast %29 : vector<1x16x1xf32> to vector<1x16x16xf32>
    %31 = arith.mulf %30, %3 : vector<1x16x16xf32>
    %cst_12 = arith.constant dense<0.000000e+00> : vector<1x16xf32>
    %32 = vector.multi_reduction <add>, %31, %cst_12 [1] : vector<1x16x16xf32> to vector<1x16xf32>
    %33 = vector.shape_cast %32 : vector<1x16xf32> to vector<1x1x16xf32>
    %cst_13 = arith.constant 1.000000e+00 : f32
    %34 = vector.broadcast %cst_13 : f32 to vector<1x1x16xf32>
    %35 = arith.divf %34, %33 : vector<1x1x16xf32>
    %36 = vector.broadcast %35 : vector<1x1x16xf32> to vector<1x16x16xf32>
    %37 = arith.mulf %3, %36 : vector<1x16x16xf32>
    %cst_14 = arith.constant dense<0.000000e+00> : vector<1x16xf32>
    %38 = vector.multi_reduction <add>, %37, %cst_14 [2] : vector<1x16x16xf32> to vector<1x16xf32>
    %39 = vector.shape_cast %38 : vector<1x16xf32> to vector<1x16x1xf32>
    %cst_15 = arith.constant 1.000000e+00 : f32
    %40 = vector.broadcast %cst_15 : f32 to vector<1x16x1xf32>
    %41 = arith.divf %40, %39 : vector<1x16x1xf32>
    %c3_i32 = arith.constant 3 : i32
    %42 = vector.broadcast %41 : vector<1x16x1xf32> to vector<1x16x16xf32>
    %43 = arith.mulf %42, %3 : vector<1x16x16xf32>
    %cst_16 = arith.constant dense<0.000000e+00> : vector<1x16xf32>
    %44 = vector.multi_reduction <add>, %43, %cst_16 [1] : vector<1x16x16xf32> to vector<1x16xf32>
    %45 = vector.shape_cast %44 : vector<1x16xf32> to vector<1x1x16xf32>
    %cst_17 = arith.constant 1.000000e+00 : f32
    %46 = vector.broadcast %cst_17 : f32 to vector<1x1x16xf32>
    %47 = arith.divf %46, %45 : vector<1x1x16xf32>
    %48 = vector.broadcast %47 : vector<1x1x16xf32> to vector<1x16x16xf32>
    %49 = arith.mulf %3, %48 : vector<1x16x16xf32>
    %cst_18 = arith.constant dense<0.000000e+00> : vector<1x16xf32>
    %50 = vector.multi_reduction <add>, %49, %cst_18 [2] : vector<1x16x16xf32> to vector<1x16xf32>
    %51 = vector.shape_cast %50 : vector<1x16xf32> to vector<1x16x1xf32>
    %cst_19 = arith.constant 1.000000e+00 : f32
    %52 = vector.broadcast %cst_19 : f32 to vector<1x16x1xf32>
    %53 = arith.divf %52, %51 : vector<1x16x1xf32>
    %c4_i32 = arith.constant 4 : i32
    %54 = vector.broadcast %53 : vector<1x16x1xf32> to vector<1x16x16xf32>
    %55 = arith.mulf %54, %3 : vector<1x16x16xf32>
    %cst_20 = arith.constant dense<0.000000e+00> : vector<1x16xf32>
    %56 = vector.multi_reduction <add>, %55, %cst_20 [1] : vector<1x16x16xf32> to vector<1x16xf32>
    %57 = vector.shape_cast %56 : vector<1x16xf32> to vector<1x1x16xf32>
    %cst_21 = arith.constant 1.000000e+00 : f32
    %58 = vector.broadcast %cst_21 : f32 to vector<1x1x16xf32>
    %59 = arith.divf %58, %57 : vector<1x1x16xf32>
    %60 = vector.broadcast %59 : vector<1x1x16xf32> to vector<1x16x16xf32>
    %61 = arith.mulf %3, %60 : vector<1x16x16xf32>
    %cst_22 = arith.constant dense<0.000000e+00> : vector<1x16xf32>
    %62 = vector.multi_reduction <add>, %61, %cst_22 [2] : vector<1x16x16xf32> to vector<1x16xf32>
    %63 = vector.shape_cast %62 : vector<1x16xf32> to vector<1x16x1xf32>
    %cst_23 = arith.constant 1.000000e+00 : f32
    %64 = vector.broadcast %cst_23 : f32 to vector<1x16x1xf32>
    %65 = arith.divf %64, %63 : vector<1x16x1xf32>
    %c5_i32 = arith.constant 5 : i32
    %66 = vector.broadcast %65 : vector<1x16x1xf32> to vector<1x16x16xf32>
    %67 = arith.mulf %66, %3 : vector<1x16x16xf32>
    %cst_24 = arith.constant dense<0.000000e+00> : vector<1x16xf32>
    %68 = vector.multi_reduction <add>, %67, %cst_24 [1] : vector<1x16x16xf32> to vector<1x16xf32>
    %69 = vector.shape_cast %68 : vector<1x16xf32> to vector<1x1x16xf32>
    %cst_25 = arith.constant 1.000000e+00 : f32
    %70 = vector.broadcast %cst_25 : f32 to vector<1x1x16xf32>
    %71 = arith.divf %70, %69 : vector<1x1x16xf32>
    %72 = vector.broadcast %71 : vector<1x1x16xf32> to vector<1x16x16xf32>
    %73 = arith.mulf %3, %72 : vector<1x16x16xf32>
    %cst_26 = arith.constant dense<0.000000e+00> : vector<1x16xf32>
    %74 = vector.multi_reduction <add>, %73, %cst_26 [2] : vector<1x16x16xf32> to vector<1x16xf32>
    %75 = vector.shape_cast %74 : vector<1x16xf32> to vector<1x16x1xf32>
    %cst_27 = arith.constant 1.000000e+00 : f32
    %76 = vector.broadcast %cst_27 : f32 to vector<1x16x1xf32>
    %77 = arith.divf %76, %75 : vector<1x16x1xf32>
    %c6_i32 = arith.constant 6 : i32
    %78 = vector.broadcast %77 : vector<1x16x1xf32> to vector<1x16x16xf32>
    %79 = arith.mulf %78, %3 : vector<1x16x16xf32>
    %cst_28 = arith.constant dense<0.000000e+00> : vector<1x16xf32>
    %80 = vector.multi_reduction <add>, %79, %cst_28 [1] : vector<1x16x16xf32> to vector<1x16xf32>
    %81 = vector.shape_cast %80 : vector<1x16xf32> to vector<1x1x16xf32>
    %cst_29 = arith.constant 1.000000e+00 : f32
    %82 = vector.broadcast %cst_29 : f32 to vector<1x1x16xf32>
    %83 = arith.divf %82, %81 : vector<1x1x16xf32>
    %84 = vector.broadcast %83 : vector<1x1x16xf32> to vector<1x16x16xf32>
    %85 = arith.mulf %3, %84 : vector<1x16x16xf32>
    %cst_30 = arith.constant dense<0.000000e+00> : vector<1x16xf32>
    %86 = vector.multi_reduction <add>, %85, %cst_30 [2] : vector<1x16x16xf32> to vector<1x16xf32>
    %87 = vector.shape_cast %86 : vector<1x16xf32> to vector<1x16x1xf32>
    %cst_31 = arith.constant 1.000000e+00 : f32
    %88 = vector.broadcast %cst_31 : f32 to vector<1x16x1xf32>
    %89 = arith.divf %88, %87 : vector<1x16x1xf32>
    %c7_i32 = arith.constant 7 : i32
    %90 = vector.broadcast %89 : vector<1x16x1xf32> to vector<1x16x16xf32>
    %91 = arith.mulf %90, %3 : vector<1x16x16xf32>
    %cst_32 = arith.constant dense<0.000000e+00> : vector<1x16xf32>
    %92 = vector.multi_reduction <add>, %91, %cst_32 [1] : vector<1x16x16xf32> to vector<1x16xf32>
    %93 = vector.shape_cast %92 : vector<1x16xf32> to vector<1x1x16xf32>
    %cst_33 = arith.constant 1.000000e+00 : f32
    %94 = vector.broadcast %cst_33 : f32 to vector<1x1x16xf32>
    %95 = arith.divf %94, %93 : vector<1x1x16xf32>
    %96 = vector.broadcast %95 : vector<1x1x16xf32> to vector<1x16x16xf32>
    %97 = arith.mulf %3, %96 : vector<1x16x16xf32>
    %cst_34 = arith.constant dense<0.000000e+00> : vector<1x16xf32>
    %98 = vector.multi_reduction <add>, %97, %cst_34 [2] : vector<1x16x16xf32> to vector<1x16xf32>
    %99 = vector.shape_cast %98 : vector<1x16xf32> to vector<1x16x1xf32>
    %cst_35 = arith.constant 1.000000e+00 : f32
    %100 = vector.broadcast %cst_35 : f32 to vector<1x16x1xf32>
    %101 = arith.divf %100, %99 : vector<1x16x1xf32>
    %c8_i32 = arith.constant 8 : i32
    %102 = vector.broadcast %101 : vector<1x16x1xf32> to vector<1x16x16xf32>
    %103 = arith.mulf %102, %3 : vector<1x16x16xf32>
    %cst_36 = arith.constant dense<0.000000e+00> : vector<1x16xf32>
    %104 = vector.multi_reduction <add>, %103, %cst_36 [1] : vector<1x16x16xf32> to vector<1x16xf32>
    %105 = vector.shape_cast %104 : vector<1x16xf32> to vector<1x1x16xf32>
    %cst_37 = arith.constant 1.000000e+00 : f32
    %106 = vector.broadcast %cst_37 : f32 to vector<1x1x16xf32>
    %107 = arith.divf %106, %105 : vector<1x1x16xf32>
    %108 = vector.broadcast %107 : vector<1x1x16xf32> to vector<1x16x16xf32>
    %109 = arith.mulf %3, %108 : vector<1x16x16xf32>
    %cst_38 = arith.constant dense<0.000000e+00> : vector<1x16xf32>
    %110 = vector.multi_reduction <add>, %109, %cst_38 [2] : vector<1x16x16xf32> to vector<1x16xf32>
    %111 = vector.shape_cast %110 : vector<1x16xf32> to vector<1x16x1xf32>
    %cst_39 = arith.constant 1.000000e+00 : f32
    %112 = vector.broadcast %cst_39 : f32 to vector<1x16x1xf32>
    %113 = arith.divf %112, %111 : vector<1x16x1xf32>
    %c9_i32 = arith.constant 9 : i32
    %114 = vector.broadcast %113 : vector<1x16x1xf32> to vector<1x16x16xf32>
    %115 = arith.mulf %114, %3 : vector<1x16x16xf32>
    %cst_40 = arith.constant dense<0.000000e+00> : vector<1x16xf32>
    %116 = vector.multi_reduction <add>, %115, %cst_40 [1] : vector<1x16x16xf32> to vector<1x16xf32>
    %117 = vector.shape_cast %116 : vector<1x16xf32> to vector<1x1x16xf32>
    %cst_41 = arith.constant 1.000000e+00 : f32
    %118 = vector.broadcast %cst_41 : f32 to vector<1x1x16xf32>
    %119 = arith.divf %118, %117 : vector<1x1x16xf32>
    %120 = vector.broadcast %119 : vector<1x1x16xf32> to vector<1x16x16xf32>
    %121 = arith.mulf %3, %120 : vector<1x16x16xf32>
    %cst_42 = arith.constant dense<0.000000e+00> : vector<1x16xf32>
    %122 = vector.multi_reduction <add>, %121, %cst_42 [2] : vector<1x16x16xf32> to vector<1x16xf32>
    %123 = vector.shape_cast %122 : vector<1x16xf32> to vector<1x16x1xf32>
    %cst_43 = arith.constant 1.000000e+00 : f32
    %124 = vector.broadcast %cst_43 : f32 to vector<1x16x1xf32>
    %125 = arith.divf %124, %123 : vector<1x16x1xf32>
    %cst_44 = arith.constant -1.000000e+00 : f32
    %126 = vector.broadcast %cst_44 : f32 to vector<1x16x16xf32>
    %127 = arith.mulf %126, %0 : vector<1x16x16xf32>
    %128 = math.log %125 : vector<1x16x1xf32>
    %129 = vector.broadcast %128 : vector<1x16x1xf32> to vector<1x16x16xf32>
    %130 = arith.addf %127, %129 : vector<1x16x16xf32>
    %131 = math.log %119 : vector<1x1x16xf32>
    %132 = vector.broadcast %131 : vector<1x1x16xf32> to vector<1x16x16xf32>
    %133 = arith.addf %130, %132 : vector<1x16x16xf32>
    %c0_45 = arith.constant 0 : index
    %c0_46 = arith.constant 0 : index
    %c0_47 = arith.constant 0 : index
    %134 = vector.load %arg2[%c0_45, %c0_46, %c0_47] : memref<1x16x16xf32, #tpu.memory_space<vmem>>, vector<1x16x16xf32>
    tpu.vector_store %arg2[%c0_45, %c0_46, %c0_47], %133 {strides = array<i32>} : memref<1x16x16xf32, #tpu.memory_space<vmem>>, vector<1x16x16xf32>,
    return
  }
  func.func @transform_0(%arg0: i32) -> (i32, i32, i32) {
    %c0_i32 = arith.constant 0 : i32
    %c0_i32_0 = arith.constant 0 : i32
    %c0_i32_1 = arith.constant 0 : i32
    return %arg0, %c0_i32, %c0_i32_0 : i32, i32, i32
  }
  func.func @transform_1(%arg0: i32) -> (i32, i32, i32) {
    %c0_i32 = arith.constant 0 : i32
    %c0_i32_0 = arith.constant 0 : i32
    %c0_i32_1 = arith.constant 0 : i32
    return %arg0, %c0_i32, %c0_i32_0 : i32, i32, i32
  }
}

</mosaic_0001>

<bundles_post_ra>
// kernel: tpu_custom_call.1
= control target key start
LH: loop header
LB: loop body
LE: loop exit
PB: predicated region body
PF: predicated region fallthrough
CT: control target
= control target key end

     0   :  { %6 = vsyncpa [#allocation3], 0  ;;  %s1360_s0 = inlined_call_operand.hbm [shape: f32[2,16,16], index: 0, kind: input, shape index: {}]   ;;  %s1361_s1 = inlined_call_operand.hbm [shape: f32[2,16,16], index: 1, kind: output, shape index: {}]  }
   0x1   :  { %8 = vsyncpa [#allocation3 + $0x1], 0 }
   0x2   :  { %9 = vsyncpa [#allocation4], 0 }
   0x3   :  { %11 = vsyncpa [#allocation4 + $0x1], 0  ;;  %s1135_s6 = smov 0   ;;  %s1137_s7 = smov 0  }
   0x4   :  { %s1139_s8 = smov 0   ;;  %s1141_s9 = smov 0  }
   0x5 LB: > { %s1156_s10 = sadd.s32 4294967295, %s1119_s9   ;;  %s887_s11 = sadd.s32 4294967294, %s1119_s9   ;;  %s1119_s9 = sphi %s1141_s9, %s1371_s9   ;;  %s1115_s8 = sphi %s1139_s8, %s1370_s8   ;;  %s1111_s7 = sphi %s1137_s7, %s1369_s7   ;;  %s1107_s6 = sphi %s1135_s6, %s1368_s6  }
   0x6   : > { %s1160_s12 = sadd.s32 1, %s1119_s9   ;;  %s24_s13 = sadd.s32 1, %s1115_s8 }
   0x7   : > { %s21_s14 = ssub.s32 %s1119_s9, %s1160_s12  ;;  %p31_p0 = scmp.ne.s32.totalorder %s1115_s8, %s1111_s7 }
   0x8   : > { %p22_p1 = scmp.eq.s32.totalorder %s21_s14, 0  ;;  %p32_p2 = scmp.eq.s32.totalorder %s1119_s9, 0 }
   0x9   : > { %p37_p3 = scmp.ne.s32.totalorder %s1111_s7, %s1107_s6  ;;  %p38_p4 = scmp.eq.s32.totalorder %s1156_s10, 0 }
   0xa   : > { %s1172_s15 = scalar_select %p22_p1, %s1115_s8, %s24_s13  }
   0xb   : > { %p1174_p5 = por %p32_p2, %p31_p0  ;;  %p1178_p6 = por %p38_p4, %p37_p3 }
   0xc   : > { %p61_p7 = scmp.eq.s32.totalorder %s1156_s10, 1  ;;  %p67_p8 = scmp.eq.s32.totalorder %s887_s11, 1 }
   0xd   : > { %p915_p10 = scmp.lt.s32.totalorder %s1119_s9, 2  ;;  %s87_s20 = sand.u32 1, %s1115_s8  }
   0xe   : > { %p1185_p11 = por %p61_p7, %p31_p0  ;;  %p1189_p12 = por %p67_p8, %p37_p3 }
   0xf   : > { %s901_s21 = sshll.u32 %s1119_s9, 4  ;;  %s890_s22 = sshll.u32 %s87_s20, 4 }
  0x10   : > { %s96_s25 = scalar_lea.hbm %s1360_s0, %s901_s21  ;;  %s91_s27 = scalar_lea.vmem [#allocation2], %s890_s22 }
  0x11   : > { %s97_s26 = sshll.u32 %s96_s25, 4  ;;  %s99_s28 = sshll.u32 %s91_s27, 4  ;;  %s98_s26 = int_to_ptr.hbm [resolvable:$true] %s97_s26  ;;  %s100_s28 = int_to_ptr.vmem [resolvable:$true] %s99_s28 }
  0x12   : > { %p1200_p13 = pnand %p915_p10, %p1174_p5  ;;  %p893_p0 = scmp.ge.s32.totalorder %s1119_s9, 1 }
  0x13   : > { %p107_p1 = scmp.lt.s32.totalorder %s1119_s9, 3  ;;  %s88_s30 = scalar_lea.sflag [#allocation3], %s87_s20 }
  0x14   : > { %s1023_s2 = sshra.s32 %s98_s26, 4  ;;  %p1027_p3 = pneg %p1200_p13  ;;  %s1024_s2 = int_to_ptr.hbm [resolvable:$true] %s1023_s2 }
  0x15   : > { %s1025_s3 = scalar_lea.hbm %s1024_s2, 16  ;;  %s1030_s11 = scalar_lea.hbm %s1360_s0, 32 }
  0x16   : > { %p1026_p2 = scmp.ne.s32.totalorder %s1024_s2, %s1025_s3  ;;  %p1031_p5 = scmp.lt.s32.totalorder %s1024_s2, %s1360_s0 }
  0x17   : > { %p1032_p8 = scmp.lt.s32.totalorder %s1030_s11, %s1025_s3 }
  0x18   : > { %p1028_p4 = pnand %p1027_p3, %p1026_p2 }
  0x19   : > { %p1033_p10 = por %p1032_p8, %p1031_p5 }
  0x1a   : > { %p1029_p7 = pneg %p1028_p4 }
  0x1c   : > { %p1034_p9 = pnand %p1033_p10, %p1029_p7 }
  0x1e   : > { %1037 = shalt.err (!%p1034_p9)
}
  0x1f   : > { %s1121_s16 = smov 128   ;;  %s1122_s20 = smov 8  }
  0x20   : > { %910 = dma.hbm_to_vmem [thread:$0]  (!%p1200_p13), %s98_s26, 256, %s100_s28, %s88_s30, %s1121_s16, %s1121_s16, %s1122_s20  }
  0x21   : > { %p108_p2 = pnand %p893_p0, %p107_p1 }
  0x22   : > { %s1221_s21 = sand.u32 (!%p108_p2), 1, %s1111_s7  }
  0x23   : > { %111 = sbr.rel (%p108_p2) target bundleno = 1802 (0x70a), region = 24  ;;  %s894_s22 = sshll.u32 (!%p108_p2), %s1221_s21, 4 }
  0x24   : > { %s114_s23 = scalar_lea.sflag (!%p108_p2), [#allocation3], %s1221_s21  ;;  %s117_s24 = scalar_lea.vmem (!%p108_p2), [#allocation2], %s894_s22 }
  0x28   : > { %1098 = dma.done.wait (%p1178_p6), %s114_s23, 256  }
  0x29   : > { %1100 = vsyncadd (%p1178_p6), %s114_s23, 4294967040  ;;  %v137_v0 = vld [vmem:[%s117_s24] sm:$0xff]  ;;  %v138_v1 = vld [vmem:[%s117_s24 + $0x8] sm:$0xff]  ;;  %vm147_vm0 = vcmask 130048   ;;  %s902_s17 = sshll.u32 %s1156_s10, 4  ;;  %s136_s28 = scalar_lea.vmem [#allocation5], %s894_s22 }
  0x2a   : > { %v1231_v2 = vmul.f32 -1.0, %v137_v0  ;;  %v1233_v3 = vmul.f32 -1.0, %v138_v1  ;;  %s810_s27 = scalar_lea.hbm %s1361_s1, %s902_s17  ;;  %s811_s29 = sshll.u32 %s136_s28, 4  ;;  %s812_s29 = int_to_ptr.vmem [resolvable:$true] %s811_s29 }
  0x2b   : > { %s813_s30 = sshll.u32 %s810_s27, 4  ;;  %s799_s10 = scalar_lea.sflag [#allocation4], %s1221_s21  ;;  %s814_s30 = int_to_ptr.hbm [resolvable:$true] %s813_s30 }
  0x2c   : > { %v141_v4 = vmul.f32 1.442695, %v1231_v2  ;;  %v143_v5 = vmul.f32 1.442695, %v1233_v3  ;;  %s1067_s2 = sshra.s32 %s814_s30, 4  ;;  %s1073_s11 = scalar_lea.hbm %s1361_s1, 32  ;;  %s1068_s2 = int_to_ptr.hbm [resolvable:$true] %s1067_s2 }
  0x2d   : > { %s1069_s3 = scalar_lea.hbm %s1068_s2, 16  ;;  %p1074_p0 = scmp.lt.s32.totalorder %s1068_s2, %s1361_s1 }
  0x2e   : > { %953 = vpow2.f32 %v141_v4  ;;  %p1070_p6 = scmp.ne.s32.totalorder %s1068_s2, %s1069_s3  ;;  %p1075_p1 = scmp.lt.s32.totalorder %s1073_s11, %s1069_s3 }
  0x2f   : > { %955 = vpow2.f32 %v143_v5 }
  0x30   : > { %p1071_p9 = pnand %p1070_p6, %p1185_p11  ;;  %p1076_p3 = por %p1075_p1, %p1074_p0 }
  0x32   : > { %p1072_p13 = pneg %p1071_p9 }
  0x34   : > { %v1237_v6 = vpop.eup %953  ;;  %p1077_p4 = pnand %p1076_p3, %p1072_p13 }
  0x35   : > { %v1239_v7 = vpop.eup %955  ;;  %v145_v8 = vmul.f32 0.0625, %v1237_v6 }
  0x36   : > { %v146_v9 = vmul.f32 0.0625, %v1239_v7 }
  0x37   : > { %v148_v10 = vsel %vm147_vm0, %v145_v8, 0.0 }
  0x38   : > { %v149_v11 = vsel %vm147_vm0, %v146_v9, 0.0 }
  0x39   : > { %v150_v12 = vadd.f32 %v149_v11, %v148_v10 }
  0x3b   : > { %v151_v13 = vrot.slane %v150_v12, 4 }
  0x3d   : > { %v152_v14 = vadd.f32 %v151_v13, %v150_v12 }
  0x3f   : > { %v153_v15 = vrot.slane %v152_v14, 2 }
  0x41   : > { %v154_v16 = vadd.f32 %v153_v15, %v152_v14 }
  0x43   : > { %v155_v17 = vrot.slane %v154_v16, 1 }
  0x45   : > { %v156_v18 = vadd.f32 %v155_v17, %v154_v16 }
  0x47   : > { %957 = vrcp.f32 %v156_v18  ;;  %v168_v21 = vand.u32 2147483648, %v156_v18  ;;  %vm162_vm1 = vweird.f32 %v156_v18  ;;  %v166_v23 = vand.u32 2147483647, %v156_v18 }
  0x49   : > { %v169_v25 = vor.u32 1.1754944e-38, %v168_v21  ;;  %vm167_vm4 = vcmp.eq.f32.partialorder %v166_v23, 8.507059e+37 }
  0x4d   : > { %v958_v19 = vpop.eup %957 }
  0x4e   : > { %v158_v20 = vmul.f32 %v958_v19, %v156_v18  ;;  %vm163_vm2 = vweird.f32 %v958_v19 }
  0x4f   : > { %vm164_vm3 = vmor %vm162_vm1, %vm163_vm2 }
  0x50   : > { %v159_v22 = vsub.f32 1.0, %v158_v20 }
  0x52   : > { %v160_v24 = vmul.f32 %v958_v19, %v159_v22 }
  0x54   : > { %v161_v26 = vadd.f32 %v958_v19, %v160_v24 }
  0x56   : > { %v165_v27 = vsel %vm164_vm3, %v958_v19, %v161_v26 }
  0x57   : > { %v170_v28 = vsel %vm167_vm4, %v169_v25, %v165_v27 }
  0x58   : > { %v172_v29 = vmul.f32 %v1237_v6, %v170_v28  ;;  %v173_v31 = vmul.f32 %v1239_v7, %v170_v28 }
  0x5a   : > { %v174_v30 = vsel %vm147_vm0, %v172_v29, 0.0  ;;  %v177_v32 = vsel %vm147_vm0, %v173_v31, 0.0 }
  0x5b   : > { %175 = vadd.xlane.f32.xlu0 %v174_v30 }
  0x63   : > { %178 = vadd.xlane.f32.xlu0 %v177_v32 }
  0xce   : > { %v176_v33 = vpop.xlane.xlu0 %175 }
  0xcf   : > { %959 = vrcp.f32 %v176_v33  ;;  %v191_v41 = vand.u32 2147483648, %v176_v33  ;;  %vm185_vm6 = vweird.f32 %v176_v33  ;;  %v189_v42 = vand.u32 2147483647, %v176_v33 }
  0xd1   : > { %v192_v46 = vor.u32 1.1754944e-38, %v191_v41  ;;  %vm190_vm8 = vcmp.eq.f32.partialorder %v189_v42, 8.507059e+37 }
  0xd5   : > { %v960_v34 = vpop.eup %959 }
  0xd6   : > { %v181_v35 = vmul.f32 %v960_v34, %v176_v33  ;;  %v179_v36 = vpop.xlane.xlu0 %178  ;;  %vm186_vm5 = vweird.f32 %v960_v34 }
  0xd7   : > { %961 = vrcp.f32 %v179_v36  ;;  %vm187_vm7 = vmor %vm185_vm6, %vm186_vm5  ;;  %v206_v47 = vand.u32 2147483648, %v179_v36  ;;  %v204_v49 = vand.u32 2147483647, %v179_v36  ;;  %vm200_vm10 = vweird.f32 %v179_v36 }
  0xd8   : > { %v182_v37 = vsub.f32 1.0, %v181_v35 }
  0xd9   : > { %v207_v52 = vor.u32 1.1754944e-38, %v206_v47  ;;  %vm205_vm12 = vcmp.eq.f32.partialorder %v204_v49, 8.507059e+37 }
  0xda   : > { %v183_v38 = vmul.f32 %v960_v34, %v182_v37 }
  0xdc   : > { %v184_v39 = vadd.f32 %v960_v34, %v183_v38 }
  0xdd   : > { %v962_v40 = vpop.eup %961 }
  0xde   : > { %v196_v43 = vmul.f32 %v962_v40, %v179_v36  ;;  %v188_v44 = vsel %vm187_vm7, %v960_v34, %v184_v39  ;;  %vm201_vm9 = vweird.f32 %v962_v40 }
  0xdf   : > { %v193_v50 = vsel %vm190_vm8, %v192_v46, %v188_v44  ;;  %vm202_vm11 = vmor %vm200_vm10, %vm201_vm9 }
  0xe0   : > { %v197_v45 = vsub.f32 1.0, %v196_v43  ;;  %v210_v53 = vmul.f32 %v1237_v6, %v193_v50 }
  0xe2   : > { %v198_v48 = vmul.f32 %v962_v40, %v197_v45  ;;  %v212_v57 = vsel %vm147_vm0, %v210_v53, 0.0 }
  0xe4   : > { %v199_v51 = vadd.f32 %v962_v40, %v198_v48 }
  0xe6   : > { %v203_v54 = vsel %vm202_vm11, %v962_v40, %v199_v51 }
  0xe7   : > { %v208_v55 = vsel %vm205_vm12, %v207_v52, %v203_v54 }
  0xe8   : > { %v211_v56 = vmul.f32 %v1239_v7, %v208_v55 }
  0xea   : > { %v213_v58 = vsel %vm147_vm0, %v211_v56, 0.0 }
  0xeb   : > { %v214_v59 = vadd.f32 %v213_v58, %v212_v57 }
  0xed   : > { %v215_v60 = vrot.slane %v214_v59, 4 }
  0xef   : > { %v216_v61 = vadd.f32 %v215_v60, %v214_v59 }
  0xf1   : > { %v217_v62 = vrot.slane %v216_v61, 2 }
  0xf3   : > { %v218_v63 = vadd.f32 %v217_v62, %v216_v61 }
  0xf5   : > { %v219_v0 = vrot.slane %v218_v63, 1 }
  0xf7   : > { %v220_v1 = vadd.f32 %v219_v0, %v218_v63 }
  0xf9   : > { %963 = vrcp.f32 %v220_v1  ;;  %v232_v9 = vand.u32 2147483648, %v220_v1  ;;  %v230_v11 = vand.u32 2147483647, %v220_v1  ;;  %vm226_vm14 = vweird.f32 %v220_v1 }
  0xfb   : > { %v233_v13 = vor.u32 1.1754944e-38, %v232_v9  ;;  %vm231_vm1 = vcmp.eq.f32.partialorder %v230_v11, 8.507059e+37 }
  0xff   : > { %v964_v4 = vpop.eup %963 }
 0x100   : > { %v222_v5 = vmul.f32 %v964_v4, %v220_v1  ;;  %vm227_vm13 = vweird.f32 %v964_v4 }
 0x101   : > { %vm228_vm15 = vmor %vm226_vm14, %vm227_vm13 }
 0x102   : > { %v223_v8 = vsub.f32 1.0, %v222_v5 }
 0x104   : > { %v224_v10 = vmul.f32 %v964_v4, %v223_v8 }
 0x106   : > { %v225_v12 = vadd.f32 %v964_v4, %v224_v10 }
 0x108   : > { %v229_v14 = vsel %vm228_vm15, %v964_v4, %v225_v12 }
 0x109   : > { %v234_v15 = vsel %vm231_vm1, %v233_v13, %v229_v14 }
 0x10a   : > { %v236_v16 = vmul.f32 %v1237_v6, %v234_v15  ;;  %v237_v18 = vmul.f32 %v1239_v7, %v234_v15 }
 0x10c   : > { %v238_v17 = vsel %vm147_vm0, %v236_v16, 0.0  ;;  %v241_v19 = vsel %vm147_vm0, %v237_v18, 0.0 }
 0x10d   : > { %239 = vadd.xlane.f32.xlu1 %v238_v17 }
 0x115   : > { %242 = vadd.xlane.f32.xlu1 %v241_v19 }
 0x180   : > { %v240_v20 = vpop.xlane.xlu1 %239 }
 0x181   : > { %965 = vrcp.f32 %v240_v20  ;;  %v255_v28 = vand.u32 2147483648, %v240_v20  ;;  %vm249_vm3 = vweird.f32 %v240_v20  ;;  %v253_v29 = vand.u32 2147483647, %v240_v20 }
 0x183   : > { %v256_v33 = vor.u32 1.1754944e-38, %v255_v28  ;;  %vm254_vm5 = vcmp.eq.f32.partialorder %v253_v29, 8.507059e+37 }
 0x187   : > { %v966_v21 = vpop.eup %965 }
 0x188   : > { %v245_v22 = vmul.f32 %v966_v21, %v240_v20  ;;  %v243_v23 = vpop.xlane.xlu1 %242  ;;  %vm250_vm2 = vweird.f32 %v966_v21 }
 0x189   : > { %967 = vrcp.f32 %v243_v23  ;;  %vm251_vm4 = vmor %vm249_vm3, %vm250_vm2  ;;  %v270_v34 = vand.u32 2147483648, %v243_v23  ;;  %v268_v36 = vand.u32 2147483647, %v243_v23  ;;  %vm264_vm7 = vweird.f32 %v243_v23 }
 0x18a   : > { %v246_v24 = vsub.f32 1.0, %v245_v22 }
 0x18b   : > { %v271_v39 = vor.u32 1.1754944e-38, %v270_v34  ;;  %vm269_vm9 = vcmp.eq.f32.partialorder %v268_v36, 8.507059e+37 }
 0x18c   : > { %v247_v25 = vmul.f32 %v966_v21, %v246_v24 }
 0x18e   : > { %v248_v26 = vadd.f32 %v966_v21, %v247_v25 }
 0x18f   : > { %v968_v27 = vpop.eup %967 }
 0x190   : > { %v260_v30 = vmul.f32 %v968_v27, %v243_v23  ;;  %v252_v31 = vsel %vm251_vm4, %v966_v21, %v248_v26  ;;  %vm265_vm6 = vweird.f32 %v968_v27 }
 0x191   : > { %v257_v37 = vsel %vm254_vm5, %v256_v33, %v252_v31  ;;  %vm266_vm8 = vmor %vm264_vm7, %vm265_vm6 }
 0x192   : > { %v261_v32 = vsub.f32 1.0, %v260_v30  ;;  %v274_v40 = vmul.f32 %v1237_v6, %v257_v37 }
 0x194   : > { %v262_v35 = vmul.f32 %v968_v27, %v261_v32  ;;  %v276_v44 = vsel %vm147_vm0, %v274_v40, 0.0 }
 0x196   : > { %v263_v38 = vadd.f32 %v968_v27, %v262_v35 }
 0x198   : > { %v267_v41 = vsel %vm266_vm8, %v968_v27, %v263_v38 }
 0x199   : > { %v272_v42 = vsel %vm269_vm9, %v271_v39, %v267_v41 }
 0x19a   : > { %v275_v43 = vmul.f32 %v1239_v7, %v272_v42 }
 0x19c   : > { %v277_v45 = vsel %vm147_vm0, %v275_v43, 0.0 }
 0x19d   : > { %v278_v46 = vadd.f32 %v277_v45, %v276_v44 }
 0x19f   : > { %v279_v47 = vrot.slane %v278_v46, 4 }
 0x1a1   : > { %v280_v48 = vadd.f32 %v279_v47, %v278_v46 }
 0x1a3   : > { %v281_v49 = vrot.slane %v280_v48, 2 }
 0x1a5   : > { %v282_v50 = vadd.f32 %v281_v49, %v280_v48 }
 0x1a7   : > { %v283_v51 = vrot.slane %v282_v50, 1 }
 0x1a9   : > { %v284_v52 = vadd.f32 %v283_v51, %v282_v50 }
 0x1ab   : > { %969 = vrcp.f32 %v284_v52  ;;  %v296_v56 = vand.u32 2147483648, %v284_v52  ;;  %v294_v58 = vand.u32 2147483647, %v284_v52  ;;  %vm290_vm11 = vweird.f32 %v284_v52 }
 0x1ad   : > { %v297_v60 = vor.u32 1.1754944e-38, %v296_v56  ;;  %vm295_vm13 = vcmp.eq.f32.partialorder %v294_v58, 8.507059e+37 }
 0x1b1   : > { %v970_v53 = vpop.eup %969 }
 0x1b2   : > { %v286_v54 = vmul.f32 %v970_v53, %v284_v52  ;;  %vm291_vm10 = vweird.f32 %v970_v53 }
 0x1b3   : > { %vm292_vm12 = vmor %vm290_vm11, %vm291_vm10 }
 0x1b4   : > { %v287_v55 = vsub.f32 1.0, %v286_v54 }
 0x1b6   : > { %v288_v57 = vmul.f32 %v970_v53, %v287_v55 }
 0x1b8   : > { %v289_v59 = vadd.f32 %v970_v53, %v288_v57 }
 0x1ba   : > { %v293_v61 = vsel %vm292_vm12, %v970_v53, %v289_v59 }
 0x1bb   : > { %v298_v62 = vsel %vm295_vm13, %v297_v60, %v293_v61 }
 0x1bc   : > { %v300_v63 = vmul.f32 %v1237_v6, %v298_v62  ;;  %v301_v1 = vmul.f32 %v1239_v7, %v298_v62 }
 0x1be   : > { %v302_v0 = vsel %vm147_vm0, %v300_v63, 0.0  ;;  %v305_v4 = vsel %vm147_vm0, %v301_v1, 0.0 }
 0x1bf   : > { %303 = vadd.xlane.f32.xlu2 %v302_v0 }
 0x1c7   : > { %306 = vadd.xlane.f32.xlu2 %v305_v4 }
 0x232   : > { %v304_v5 = vpop.xlane.xlu2 %303 }
 0x233   : > { %971 = vrcp.f32 %v304_v5  ;;  %v319_v15 = vand.u32 2147483648, %v304_v5  ;;  %vm313_vm15 = vweird.f32 %v304_v5  ;;  %v317_v16 = vand.u32 2147483647, %v304_v5 }
 0x235   : > { %v320_v20 = vor.u32 1.1754944e-38, %v319_v15  ;;  %vm318_vm2 = vcmp.eq.f32.partialorder %v317_v16, 8.507059e+37 }
 0x239   : > { %v972_v8 = vpop.eup %971 }
 0x23a   : > { %v309_v9 = vmul.f32 %v972_v8, %v304_v5  ;;  %v307_v10 = vpop.xlane.xlu2 %306  ;;  %vm314_vm14 = vweird.f32 %v972_v8 }
 0x23b   : > { %973 = vrcp.f32 %v307_v10  ;;  %vm315_vm1 = vmor %vm313_vm15, %vm314_vm14  ;;  %v334_v21 = vand.u32 2147483648, %v307_v10  ;;  %v332_v23 = vand.u32 2147483647, %v307_v10  ;;  %vm328_vm4 = vweird.f32 %v307_v10 }
 0x23c   : > { %v310_v11 = vsub.f32 1.0, %v309_v9 }
 0x23d   : > { %v335_v26 = vor.u32 1.1754944e-38, %v334_v21  ;;  %vm333_vm6 = vcmp.eq.f32.partialorder %v332_v23, 8.507059e+37 }
 0x23e   : > { %v311_v12 = vmul.f32 %v972_v8, %v310_v11 }
 0x240   : > { %v312_v13 = vadd.f32 %v972_v8, %v311_v12 }
 0x241   : > { %v974_v14 = vpop.eup %973 }
 0x242   : > { %v324_v17 = vmul.f32 %v974_v14, %v307_v10  ;;  %v316_v18 = vsel %vm315_vm1, %v972_v8, %v312_v13  ;;  %vm329_vm3 = vweird.f32 %v974_v14 }
 0x243   : > { %v321_v24 = vsel %vm318_vm2, %v320_v20, %v316_v18  ;;  %vm330_vm5 = vmor %vm328_vm4, %vm329_vm3 }
 0x244   : > { %v325_v19 = vsub.f32 1.0, %v324_v17  ;;  %v338_v27 = vmul.f32 %v1237_v6, %v321_v24 }
 0x246   : > { %v326_v22 = vmul.f32 %v974_v14, %v325_v19  ;;  %v340_v31 = vsel %vm147_vm0, %v338_v27, 0.0 }
 0x248   : > { %v327_v25 = vadd.f32 %v974_v14, %v326_v22 }
 0x24a   : > { %v331_v28 = vsel %vm330_vm5, %v974_v14, %v327_v25 }
 0x24b   : > { %v336_v29 = vsel %vm333_vm6, %v335_v26, %v331_v28 }
 0x24c   : > { %v339_v30 = vmul.f32 %v1239_v7, %v336_v29 }
 0x24e   : > { %v341_v32 = vsel %vm147_vm0, %v339_v30, 0.0 }
 0x24f   : > { %v342_v33 = vadd.f32 %v341_v32, %v340_v31 }
 0x251   : > { %v343_v34 = vrot.slane %v342_v33, 4 }
 0x253   : > { %v344_v35 = vadd.f32 %v343_v34, %v342_v33 }
 0x255   : > { %v345_v36 = vrot.slane %v344_v35, 2 }
 0x257   : > { %v346_v37 = vadd.f32 %v345_v36, %v344_v35 }
 0x259   : > { %v347_v38 = vrot.slane %v346_v37, 1 }
 0x25b   : > { %v348_v39 = vadd.f32 %v347_v38, %v346_v37 }
 0x25d   : > { %975 = vrcp.f32 %v348_v39  ;;  %v360_v43 = vand.u32 2147483648, %v348_v39  ;;  %v358_v45 = vand.u32 2147483647, %v348_v39  ;;  %vm354_vm8 = vweird.f32 %v348_v39 }
 0x25f   : > { %v361_v47 = vor.u32 1.1754944e-38, %v360_v43  ;;  %vm359_vm10 = vcmp.eq.f32.partialorder %v358_v45, 8.507059e+37 }
 0x263   : > { %v976_v40 = vpop.eup %975 }
 0x264   : > { %v350_v41 = vmul.f32 %v976_v40, %v348_v39  ;;  %vm355_vm7 = vweird.f32 %v976_v40 }
 0x265   : > { %vm356_vm9 = vmor %vm354_vm8, %vm355_vm7 }
 0x266   : > { %v351_v42 = vsub.f32 1.0, %v350_v41 }
 0x268   : > { %v352_v44 = vmul.f32 %v976_v40, %v351_v42 }
 0x26a   : > { %v353_v46 = vadd.f32 %v976_v40, %v352_v44 }
 0x26c   : > { %v357_v48 = vsel %vm356_vm9, %v976_v40, %v353_v46 }
 0x26d   : > { %v362_v49 = vsel %vm359_vm10, %v361_v47, %v357_v48 }
 0x26e   : > { %v365_v50 = vmul.f32 %v1239_v7, %v362_v49  ;;  %v364_v51 = vmul.f32 %v1237_v6, %v362_v49 }
 0x270   : > { %v369_v52 = vsel %vm147_vm0, %v365_v50, 0.0  ;;  %v366_v53 = vsel %vm147_vm0, %v364_v51, 0.0 }
 0x271   : > { %370 = vadd.xlane.f32.xlu1 %v369_v52  ;;  %367 = vadd.xlane.f32.xlu0 %v366_v53 }
 0x2e4   : > { %v371_v54 = vpop.xlane.xlu1 %370  ;;  %v368_v55 = vpop.xlane.xlu0 %367 }
 0x2e5   : > { %977 = vrcp.f32 %v371_v54  ;;  %v398_v61 = vand.u32 2147483648, %v371_v54  ;;  %v396_v0 = vand.u32 2147483647, %v371_v54  ;;  %v383_v1 = vand.u32 2147483648, %v368_v55 }
 0x2e6   : > { %979 = vrcp.f32 %v368_v55  ;;  %v381_v5 = vand.u32 2147483647, %v368_v55  ;;  %vm392_vm13 = vweird.f32 %v371_v54  ;;  %vm377_vm15 = vweird.f32 %v368_v55 }
 0x2e7   : > { %v399_v9 = vor.u32 1.1754944e-38, %v398_v61  ;;  %vm397_vm1 = vcmp.eq.f32.partialorder %v396_v0, 8.507059e+37  ;;  %v384_v12 = vor.u32 1.1754944e-38, %v383_v1 }
 0x2e8   : > { %vm382_vm3 = vcmp.eq.f32.partialorder %v381_v5, 8.507059e+37 }
 0x2eb   : > { %v978_v56 = vpop.eup %977 }
 0x2ec   : > { %v980_v57 = vpop.eup %979  ;;  %v388_v58 = vmul.f32 %v978_v56, %v371_v54  ;;  %vm393_vm11 = vweird.f32 %v978_v56 }
 0x2ed   : > { %v373_v59 = vmul.f32 %v980_v57, %v368_v55  ;;  %vm378_vm12 = vweird.f32 %v980_v57  ;;  %vm394_vm14 = vmor %vm392_vm13, %vm393_vm11 }
 0x2ee   : > { %v389_v60 = vsub.f32 1.0, %v388_v58  ;;  %vm379_vm2 = vmor %vm377_vm15, %vm378_vm12 }
 0x2ef   : > { %v374_v62 = vsub.f32 1.0, %v373_v59 }
 0x2f0   : > { %v390_v63 = vmul.f32 %v978_v56, %v389_v60 }
 0x2f1   : > { %v375_v4 = vmul.f32 %v980_v57, %v374_v62 }
 0x2f2   : > { %v391_v8 = vadd.f32 %v978_v56, %v390_v63 }
 0x2f3   : > { %v376_v10 = vadd.f32 %v980_v57, %v375_v4 }
 0x2f4   : > { %v395_v11 = vsel %vm394_vm14, %v978_v56, %v391_v8 }
 0x2f5   : > { %v400_v13 = vsel %vm397_vm1, %v399_v9, %v395_v11  ;;  %v380_v14 = vsel %vm379_vm2, %v980_v57, %v376_v10 }
 0x2f6   : > { %v403_v15 = vmul.f32 %v1239_v7, %v400_v13  ;;  %v385_v16 = vsel %vm382_vm3, %v384_v12, %v380_v14 }
 0x2f7   : > { %v402_v17 = vmul.f32 %v1237_v6, %v385_v16 }
 0x2f8   : > { %v405_v18 = vsel %vm147_vm0, %v403_v15, 0.0 }
 0x2f9   : > { %v404_v19 = vsel %vm147_vm0, %v402_v17, 0.0 }
 0x2fa   : > { %v406_v20 = vadd.f32 %v405_v18, %v404_v19 }
 0x2fc   : > { %v407_v21 = vrot.slane %v406_v20, 4 }
 0x2fe   : > { %v408_v22 = vadd.f32 %v407_v21, %v406_v20 }
 0x300   : > { %v409_v23 = vrot.slane %v408_v22, 2 }
 0x302   : > { %v410_v24 = vadd.f32 %v409_v23, %v408_v22 }
 0x304   : > { %v411_v25 = vrot.slane %v410_v24, 1 }
 0x306   : > { %v412_v26 = vadd.f32 %v411_v25, %v410_v24 }
 0x308   : > { %981 = vrcp.f32 %v412_v26  ;;  %v424_v30 = vand.u32 2147483648, %v412_v26  ;;  %v422_v32 = vand.u32 2147483647, %v412_v26  ;;  %vm418_vm5 = vweird.f32 %v412_v26 }
 0x30a   : > { %v425_v34 = vor.u32 1.1754944e-38, %v424_v30  ;;  %vm423_vm7 = vcmp.eq.f32.partialorder %v422_v32, 8.507059e+37 }
 0x30e   : > { %v982_v27 = vpop.eup %981 }
 0x30f   : > { %v414_v28 = vmul.f32 %v982_v27, %v412_v26  ;;  %vm419_vm4 = vweird.f32 %v982_v27 }
 0x310   : > { %vm420_vm6 = vmor %vm418_vm5, %vm419_vm4 }
 0x311   : > { %v415_v29 = vsub.f32 1.0, %v414_v28 }
 0x313   : > { %v416_v31 = vmul.f32 %v982_v27, %v415_v29 }
 0x315   : > { %v417_v33 = vadd.f32 %v982_v27, %v416_v31 }
 0x317   : > { %v421_v35 = vsel %vm420_vm6, %v982_v27, %v417_v33 }
 0x318   : > { %v426_v36 = vsel %vm423_vm7, %v425_v34, %v421_v35 }
 0x319   : > { %v429_v37 = vmul.f32 %v1239_v7, %v426_v36  ;;  %v428_v38 = vmul.f32 %v1237_v6, %v426_v36 }
 0x31b   : > { %v433_v39 = vsel %vm147_vm0, %v429_v37, 0.0  ;;  %v430_v40 = vsel %vm147_vm0, %v428_v38, 0.0 }
 0x31c   : > { %434 = vadd.xlane.f32.xlu0 %v433_v39  ;;  %431 = vadd.xlane.f32.xlu2 %v430_v40 }
 0x38f   : > { %v435_v41 = vpop.xlane.xlu0 %434  ;;  %v432_v42 = vpop.xlane.xlu2 %431 }
 0x390   : > { %983 = vrcp.f32 %v435_v41  ;;  %v462_v48 = vand.u32 2147483648, %v435_v41  ;;  %v460_v51 = vand.u32 2147483647, %v435_v41  ;;  %v447_v52 = vand.u32 2147483648, %v432_v42 }
 0x391   : > { %985 = vrcp.f32 %v432_v42  ;;  %v445_v54 = vand.u32 2147483647, %v432_v42  ;;  %vm456_vm10 = vweird.f32 %v435_v41  ;;  %vm441_vm12 = vweird.f32 %v432_v42 }
 0x392   : > { %v463_v56 = vor.u32 1.1754944e-38, %v462_v48  ;;  %vm461_vm13 = vcmp.eq.f32.partialorder %v460_v51, 8.507059e+37  ;;  %v448_v59 = vor.u32 1.1754944e-38, %v447_v52 }
 0x393   : > { %vm446_vm15 = vcmp.eq.f32.partialorder %v445_v54, 8.507059e+37 }
 0x396   : > { %v984_v43 = vpop.eup %983 }
 0x397   : > { %v986_v44 = vpop.eup %985  ;;  %v452_v45 = vmul.f32 %v984_v43, %v435_v41  ;;  %vm457_vm8 = vweird.f32 %v984_v43 }
 0x398   : > { %v437_v46 = vmul.f32 %v986_v44, %v432_v42  ;;  %vm442_vm9 = vweird.f32 %v986_v44  ;;  %vm458_vm11 = vmor %vm456_vm10, %vm457_vm8 }
 0x399   : > { %v453_v47 = vsub.f32 1.0, %v452_v45  ;;  %vm443_vm14 = vmor %vm441_vm12, %vm442_vm9 }
 0x39a   : > { %v438_v49 = vsub.f32 1.0, %v437_v46 }
 0x39b   : > { %v454_v50 = vmul.f32 %v984_v43, %v453_v47 }
 0x39c   : > { %v439_v53 = vmul.f32 %v986_v44, %v438_v49 }
 0x39d   : > { %v455_v55 = vadd.f32 %v984_v43, %v454_v50 }
 0x39e   : > { %v440_v57 = vadd.f32 %v986_v44, %v439_v53 }
 0x39f   : > { %v459_v58 = vsel %vm458_vm11, %v984_v43, %v455_v55 }
 0x3a0   : > { %v464_v60 = vsel %vm461_vm13, %v463_v56, %v459_v58  ;;  %v444_v61 = vsel %vm443_vm14, %v986_v44, %v440_v57 }
 0x3a1   : > { %v467_v62 = vmul.f32 %v1239_v7, %v464_v60  ;;  %v449_v63 = vsel %vm446_vm15, %v448_v59, %v444_v61 }
 0x3a2   : > { %v466_v0 = vmul.f32 %v1237_v6, %v449_v63 }
 0x3a3   : > { %v469_v1 = vsel %vm147_vm0, %v467_v62, 0.0 }
 0x3a4   : > { %v468_v4 = vsel %vm147_vm0, %v466_v0, 0.0 }
 0x3a5   : > { %v470_v5 = vadd.f32 %v469_v1, %v468_v4 }
 0x3a7   : > { %v471_v8 = vrot.slane %v470_v5, 4 }
 0x3a9   : > { %v472_v9 = vadd.f32 %v471_v8, %v470_v5 }
 0x3ab   : > { %v473_v10 = vrot.slane %v472_v9, 2 }
 0x3ad   : > { %v474_v11 = vadd.f32 %v473_v10, %v472_v9 }
 0x3af   : > { %v475_v12 = vrot.slane %v474_v11, 1 }
 0x3b1   : > { %v476_v13 = vadd.f32 %v475_v12, %v474_v11 }
 0x3b3   : > { %987 = vrcp.f32 %v476_v13  ;;  %v488_v17 = vand.u32 2147483648, %v476_v13  ;;  %v486_v19 = vand.u32 2147483647, %v476_v13  ;;  %vm482_vm2 = vweird.f32 %v476_v13 }
 0x3b5   : > { %v489_v21 = vor.u32 1.1754944e-38, %v488_v17  ;;  %vm487_vm4 = vcmp.eq.f32.partialorder %v486_v19, 8.507059e+37 }
 0x3b9   : > { %v988_v14 = vpop.eup %987 }
 0x3ba   : > { %v478_v15 = vmul.f32 %v988_v14, %v476_v13  ;;  %vm483_vm1 = vweird.f32 %v988_v14 }
 0x3bb   : > { %vm484_vm3 = vmor %vm482_vm2, %vm483_vm1 }
 0x3bc   : > { %v479_v16 = vsub.f32 1.0, %v478_v15 }
 0x3be   : > { %v480_v18 = vmul.f32 %v988_v14, %v479_v16 }
 0x3c0   : > { %v481_v20 = vadd.f32 %v988_v14, %v480_v18 }
 0x3c2   : > { %v485_v22 = vsel %vm484_vm3, %v988_v14, %v481_v20 }
 0x3c3   : > { %v490_v23 = vsel %vm487_vm4, %v489_v21, %v485_v22 }
 0x3c4   : > { %v493_v24 = vmul.f32 %v1239_v7, %v490_v23  ;;  %v492_v25 = vmul.f32 %v1237_v6, %v490_v23 }
 0x3c6   : > { %v497_v26 = vsel %vm147_vm0, %v493_v24, 0.0  ;;  %v494_v27 = vsel %vm147_vm0, %v492_v25, 0.0 }
 0x3c7   : > { %498 = vadd.xlane.f32.xlu2 %v497_v26  ;;  %495 = vadd.xlane.f32.xlu1 %v494_v27 }
 0x43a   : > { %v499_v28 = vpop.xlane.xlu2 %498  ;;  %v496_v29 = vpop.xlane.xlu1 %495 }
 0x43b   : > { %989 = vrcp.f32 %v499_v28  ;;  %v526_v35 = vand.u32 2147483648, %v499_v28  ;;  %v524_v38 = vand.u32 2147483647, %v499_v28  ;;  %v511_v39 = vand.u32 2147483648, %v496_v29 }
 0x43c   : > { %991 = vrcp.f32 %v496_v29  ;;  %v509_v41 = vand.u32 2147483647, %v496_v29  ;;  %vm520_vm7 = vweird.f32 %v499_v28  ;;  %vm505_vm9 = vweird.f32 %v496_v29 }
 0x43d   : > { %v527_v43 = vor.u32 1.1754944e-38, %v526_v35  ;;  %vm525_vm10 = vcmp.eq.f32.partialorder %v524_v38, 8.507059e+37  ;;  %v512_v46 = vor.u32 1.1754944e-38, %v511_v39 }
 0x43e   : > { %vm510_vm12 = vcmp.eq.f32.partialorder %v509_v41, 8.507059e+37 }
 0x441   : > { %v990_v30 = vpop.eup %989 }
 0x442   : > { %v992_v31 = vpop.eup %991  ;;  %v516_v32 = vmul.f32 %v990_v30, %v499_v28  ;;  %vm521_vm5 = vweird.f32 %v990_v30 }
 0x443   : > { %v501_v33 = vmul.f32 %v992_v31, %v496_v29  ;;  %vm506_vm6 = vweird.f32 %v992_v31  ;;  %vm522_vm8 = vmor %vm520_vm7, %vm521_vm5 }
 0x444   : > { %v517_v34 = vsub.f32 1.0, %v516_v32  ;;  %vm507_vm11 = vmor %vm505_vm9, %vm506_vm6 }
 0x445   : > { %v502_v36 = vsub.f32 1.0, %v501_v33 }
 0x446   : > { %v518_v37 = vmul.f32 %v990_v30, %v517_v34 }
 0x447   : > { %v503_v40 = vmul.f32 %v992_v31, %v502_v36 }
 0x448   : > { %v519_v42 = vadd.f32 %v990_v30, %v518_v37 }
 0x449   : > { %v504_v44 = vadd.f32 %v992_v31, %v503_v40 }
 0x44a   : > { %v523_v45 = vsel %vm522_vm8, %v990_v30, %v519_v42 }
 0x44b   : > { %v528_v47 = vsel %vm525_vm10, %v527_v43, %v523_v45  ;;  %v508_v48 = vsel %vm507_vm11, %v992_v31, %v504_v44 }
 0x44c   : > { %v531_v49 = vmul.f32 %v1239_v7, %v528_v47  ;;  %v513_v50 = vsel %vm510_vm12, %v512_v46, %v508_v48 }
 0x44d   : > { %v530_v51 = vmul.f32 %v1237_v6, %v513_v50 }
 0x44e   : > { %v533_v52 = vsel %vm147_vm0, %v531_v49, 0.0 }
 0x44f   : > { %v532_v53 = vsel %vm147_vm0, %v530_v51, 0.0 }
 0x450   : > { %v534_v54 = vadd.f32 %v533_v52, %v532_v53 }
 0x452   : > { %v535_v55 = vrot.slane %v534_v54, 4 }
 0x454   : > { %v536_v56 = vadd.f32 %v535_v55, %v534_v54 }
 0x456   : > { %v537_v57 = vrot.slane %v536_v56, 2 }
 0x458   : > { %v538_v58 = vadd.f32 %v537_v57, %v536_v56 }
 0x45a   : > { %v539_v59 = vrot.slane %v538_v58, 1 }
 0x45c   : > { %v540_v60 = vadd.f32 %v539_v59, %v538_v58 }
 0x45e   : > { %993 = vrcp.f32 %v540_v60  ;;  %v552_v0 = vand.u32 2147483648, %v540_v60  ;;  %v550_v4 = vand.u32 2147483647, %v540_v60  ;;  %vm546_vm14 = vweird.f32 %v540_v60 }
 0x460   : > { %v553_v8 = vor.u32 1.1754944e-38, %v552_v0  ;;  %vm551_vm1 = vcmp.eq.f32.partialorder %v550_v4, 8.507059e+37 }
 0x464   : > { %v994_v61 = vpop.eup %993 }
 0x465   : > { %v542_v62 = vmul.f32 %v994_v61, %v540_v60  ;;  %vm547_vm13 = vweird.f32 %v994_v61 }
 0x466   : > { %vm548_vm15 = vmor %vm546_vm14, %vm547_vm13 }
 0x467   : > { %v543_v63 = vsub.f32 1.0, %v542_v62 }
 0x469   : > { %v544_v1 = vmul.f32 %v994_v61, %v543_v63 }
 0x46b   : > { %v545_v5 = vadd.f32 %v994_v61, %v544_v1 }
 0x46d   : > { %v549_v9 = vsel %vm548_vm15, %v994_v61, %v545_v5 }
 0x46e   : > { %v554_v10 = vsel %vm551_vm1, %v553_v8, %v549_v9 }
 0x46f   : > { %v557_v11 = vmul.f32 %v1239_v7, %v554_v10  ;;  %v556_v12 = vmul.f32 %v1237_v6, %v554_v10 }
 0x471   : > { %v561_v13 = vsel %vm147_vm0, %v557_v11, 0.0  ;;  %v558_v14 = vsel %vm147_vm0, %v556_v12, 0.0 }
 0x472   : > { %562 = vadd.xlane.f32.xlu1 %v561_v13  ;;  %559 = vadd.xlane.f32.xlu0 %v558_v14 }
 0x4e5   : > { %v563_v15 = vpop.xlane.xlu1 %562  ;;  %v560_v16 = vpop.xlane.xlu0 %559 }
 0x4e6   : > { %995 = vrcp.f32 %v563_v15  ;;  %v590_v22 = vand.u32 2147483648, %v563_v15  ;;  %v588_v25 = vand.u32 2147483647, %v563_v15  ;;  %v575_v26 = vand.u32 2147483648, %v560_v16 }
 0x4e7   : > { %997 = vrcp.f32 %v560_v16  ;;  %v573_v28 = vand.u32 2147483647, %v560_v16  ;;  %vm584_vm4 = vweird.f32 %v563_v15  ;;  %vm569_vm6 = vweird.f32 %v560_v16 }
 0x4e8   : > { %v591_v30 = vor.u32 1.1754944e-38, %v590_v22  ;;  %vm589_vm7 = vcmp.eq.f32.partialorder %v588_v25, 8.507059e+37  ;;  %v576_v33 = vor.u32 1.1754944e-38, %v575_v26 }
 0x4e9   : > { %vm574_vm9 = vcmp.eq.f32.partialorder %v573_v28, 8.507059e+37 }
 0x4ec   : > { %v996_v17 = vpop.eup %995 }
 0x4ed   : > { %v998_v18 = vpop.eup %997  ;;  %v580_v19 = vmul.f32 %v996_v17, %v563_v15  ;;  %vm585_vm2 = vweird.f32 %v996_v17 }
 0x4ee   : > { %v565_v20 = vmul.f32 %v998_v18, %v560_v16  ;;  %vm570_vm3 = vweird.f32 %v998_v18  ;;  %vm586_vm5 = vmor %vm584_vm4, %vm585_vm2 }
 0x4ef   : > { %v581_v21 = vsub.f32 1.0, %v580_v19  ;;  %vm571_vm8 = vmor %vm569_vm6, %vm570_vm3 }
 0x4f0   : > { %v566_v23 = vsub.f32 1.0, %v565_v20 }
 0x4f1   : > { %v582_v24 = vmul.f32 %v996_v17, %v581_v21 }
 0x4f2   : > { %v567_v27 = vmul.f32 %v998_v18, %v566_v23 }
 0x4f3   : > { %v583_v29 = vadd.f32 %v996_v17, %v582_v24 }
 0x4f4   : > { %v568_v31 = vadd.f32 %v998_v18, %v567_v27 }
 0x4f5   : > { %v587_v32 = vsel %vm586_vm5, %v996_v17, %v583_v29 }
 0x4f6   : > { %v592_v34 = vsel %vm589_vm7, %v591_v30, %v587_v32  ;;  %v572_v35 = vsel %vm571_vm8, %v998_v18, %v568_v31 }
 0x4f7   : > { %v595_v36 = vmul.f32 %v1239_v7, %v592_v34  ;;  %v577_v37 = vsel %vm574_vm9, %v576_v33, %v572_v35 }
 0x4f8   : > { %v594_v38 = vmul.f32 %v1237_v6, %v577_v37 }
 0x4f9   : > { %v597_v39 = vsel %vm147_vm0, %v595_v36, 0.0 }
 0x4fa   : > { %v596_v40 = vsel %vm147_vm0, %v594_v38, 0.0 }
 0x4fb   : > { %v598_v41 = vadd.f32 %v597_v39, %v596_v40 }
 0x4fd   : > { %v599_v42 = vrot.slane %v598_v41, 4 }
 0x4ff   : > { %v600_v43 = vadd.f32 %v599_v42, %v598_v41 }
 0x501   : > { %v601_v44 = vrot.slane %v600_v43, 2 }
 0x503   : > { %v602_v45 = vadd.f32 %v601_v44, %v600_v43 }
 0x505   : > { %v603_v46 = vrot.slane %v602_v45, 1 }
 0x507   : > { %v604_v47 = vadd.f32 %v603_v46, %v602_v45 }
 0x509   : > { %999 = vrcp.f32 %v604_v47  ;;  %v616_v51 = vand.u32 2147483648, %v604_v47  ;;  %v614_v53 = vand.u32 2147483647, %v604_v47  ;;  %vm610_vm11 = vweird.f32 %v604_v47 }
 0x50b   : > { %v617_v55 = vor.u32 1.1754944e-38, %v616_v51  ;;  %vm615_vm13 = vcmp.eq.f32.partialorder %v614_v53, 8.507059e+37 }
 0x50f   : > { %v1000_v48 = vpop.eup %999 }
 0x510   : > { %v606_v49 = vmul.f32 %v1000_v48, %v604_v47  ;;  %vm611_vm10 = vweird.f32 %v1000_v48 }
 0x511   : > { %vm612_vm12 = vmor %vm610_vm11, %vm611_vm10 }
 0x512   : > { %v607_v50 = vsub.f32 1.0, %v606_v49 }
 0x514   : > { %v608_v52 = vmul.f32 %v1000_v48, %v607_v50 }
 0x516   : > { %v609_v54 = vadd.f32 %v1000_v48, %v608_v52 }
 0x518   : > { %v613_v56 = vsel %vm612_vm12, %v1000_v48, %v609_v54 }
 0x519   : > { %v618_v57 = vsel %vm615_vm13, %v617_v55, %v613_v56 }
 0x51a   : > { %v621_v58 = vmul.f32 %v1239_v7, %v618_v57  ;;  %v620_v59 = vmul.f32 %v1237_v6, %v618_v57 }
 0x51c   : > { %v625_v60 = vsel %vm147_vm0, %v621_v58, 0.0  ;;  %v622_v61 = vsel %vm147_vm0, %v620_v59, 0.0 }
 0x51d   : > { %626 = vadd.xlane.f32.xlu0 %v625_v60  ;;  %623 = vadd.xlane.f32.xlu2 %v622_v61 }
 0x590   : > { %v627_v62 = vpop.xlane.xlu0 %626  ;;  %v624_v63 = vpop.xlane.xlu2 %623 }
 0x591   : > { %1001 = vrcp.f32 %v627_v62  ;;  %v654_v9 = vand.u32 2147483648, %v627_v62  ;;  %v652_v12 = vand.u32 2147483647, %v627_v62  ;;  %v639_v13 = vand.u32 2147483648, %v624_v63 }
 0x592   : > { %1003 = vrcp.f32 %v624_v63  ;;  %v637_v15 = vand.u32 2147483647, %v624_v63  ;;  %vm648_vm1 = vweird.f32 %v627_v62  ;;  %vm633_vm3 = vweird.f32 %v624_v63 }
 0x593   : > { %v655_v17 = vor.u32 1.1754944e-38, %v654_v9  ;;  %vm653_vm4 = vcmp.eq.f32.partialorder %v652_v12, 8.507059e+37  ;;  %v640_v20 = vor.u32 1.1754944e-38, %v639_v13 }
 0x594   : > { %vm638_vm6 = vcmp.eq.f32.partialorder %v637_v15, 8.507059e+37 }
 0x597   : > { %v1002_v0 = vpop.eup %1001 }
 0x598   : > { %v1004_v1 = vpop.eup %1003  ;;  %v644_v4 = vmul.f32 %v1002_v0, %v627_v62  ;;  %vm649_vm14 = vweird.f32 %v1002_v0 }
 0x599   : > { %v629_v5 = vmul.f32 %v1004_v1, %v624_v63  ;;  %vm634_vm15 = vweird.f32 %v1004_v1  ;;  %vm650_vm2 = vmor %vm648_vm1, %vm649_vm14 }
 0x59a   : > { %v645_v8 = vsub.f32 1.0, %v644_v4  ;;  %vm635_vm5 = vmor %vm633_vm3, %vm634_vm15 }
 0x59b   : > { %v630_v10 = vsub.f32 1.0, %v629_v5 }
 0x59c   : > { %v646_v11 = vmul.f32 %v1002_v0, %v645_v8 }
 0x59d   : > { %v631_v14 = vmul.f32 %v1004_v1, %v630_v10 }
 0x59e   : > { %v647_v16 = vadd.f32 %v1002_v0, %v646_v11 }
 0x59f   : > { %v632_v18 = vadd.f32 %v1004_v1, %v631_v14 }
 0x5a0   : > { %v651_v19 = vsel %vm650_vm2, %v1002_v0, %v647_v16 }
 0x5a1   : > { %v656_v21 = vsel %vm653_vm4, %v655_v17, %v651_v19  ;;  %v636_v22 = vsel %vm635_vm5, %v1004_v1, %v632_v18 }
 0x5a2   : > { %v659_v23 = vmul.f32 %v1239_v7, %v656_v21  ;;  %v641_v24 = vsel %vm638_vm6, %v640_v20, %v636_v22 }
 0x5a3   : > { %v658_v25 = vmul.f32 %v1237_v6, %v641_v24 }
 0x5a4   : > { %v661_v26 = vsel %vm147_vm0, %v659_v23, 0.0 }
 0x5a5   : > { %v660_v27 = vsel %vm147_vm0, %v658_v25, 0.0 }
 0x5a6   : > { %v662_v28 = vadd.f32 %v661_v26, %v660_v27 }
 0x5a8   : > { %v663_v29 = vrot.slane %v662_v28, 4 }
 0x5aa   : > { %v664_v30 = vadd.f32 %v663_v29, %v662_v28 }
 0x5ac   : > { %v665_v31 = vrot.slane %v664_v30, 2 }
 0x5ae   : > { %v666_v32 = vadd.f32 %v665_v31, %v664_v30 }
 0x5b0   : > { %v667_v33 = vrot.slane %v666_v32, 1 }
 0x5b2   : > { %v668_v34 = vadd.f32 %v667_v33, %v666_v32 }
 0x5b4   : > { %1005 = vrcp.f32 %v668_v34  ;;  %v680_v38 = vand.u32 2147483648, %v668_v34  ;;  %v678_v40 = vand.u32 2147483647, %v668_v34  ;;  %vm674_vm8 = vweird.f32 %v668_v34 }
 0x5b6   : > { %v681_v42 = vor.u32 1.1754944e-38, %v680_v38  ;;  %vm679_vm10 = vcmp.eq.f32.partialorder %v678_v40, 8.507059e+37 }
 0x5ba   : > { %v1006_v35 = vpop.eup %1005 }
 0x5bb   : > { %v670_v36 = vmul.f32 %v1006_v35, %v668_v34  ;;  %vm675_vm7 = vweird.f32 %v1006_v35 }
 0x5bc   : > { %vm676_vm9 = vmor %vm674_vm8, %vm675_vm7 }
 0x5bd   : > { %v671_v37 = vsub.f32 1.0, %v670_v36 }
 0x5bf   : > { %v672_v39 = vmul.f32 %v1006_v35, %v671_v37 }
 0x5c1   : > { %v673_v41 = vadd.f32 %v1006_v35, %v672_v39 }
 0x5c3   : > { %v677_v43 = vsel %vm676_vm9, %v1006_v35, %v673_v41 }
 0x5c4   : > { %v682_v44 = vsel %vm679_vm10, %v681_v42, %v677_v43 }
 0x5c5   : > { %v685_v45 = vmul.f32 %v1239_v7, %v682_v44  ;;  %v684_v46 = vmul.f32 %v1237_v6, %v682_v44 }
 0x5c7   : > { %v689_v47 = vsel %vm147_vm0, %v685_v45, 0.0  ;;  %v686_v48 = vsel %vm147_vm0, %v684_v46, 0.0 }
 0x5c8   : > { %690 = vadd.xlane.f32.xlu2 %v689_v47  ;;  %687 = vadd.xlane.f32.xlu1 %v686_v48 }
 0x63b   : > { %v691_v49 = vpop.xlane.xlu2 %690  ;;  %v688_v50 = vpop.xlane.xlu1 %687 }
 0x63c   : > { %1007 = vrcp.f32 %v691_v49  ;;  %v718_v56 = vand.u32 2147483648, %v691_v49  ;;  %v716_v59 = vand.u32 2147483647, %v691_v49  ;;  %v703_v60 = vand.u32 2147483648, %v688_v50 }
 0x63d   : > { %1009 = vrcp.f32 %v688_v50  ;;  %v701_v62 = vand.u32 2147483647, %v688_v50  ;;  %vm712_vm13 = vweird.f32 %v691_v49  ;;  %vm697_vm15 = vweird.f32 %v688_v50 }
 0x63e   : > { %v719_v0 = vor.u32 1.1754944e-38, %v718_v56  ;;  %vm717_vm1 = vcmp.eq.f32.partialorder %v716_v59, 8.507059e+37  ;;  %v704_v5 = vor.u32 1.1754944e-38, %v703_v60 }
 0x63f   : > { %vm702_vm3 = vcmp.eq.f32.partialorder %v701_v62, 8.507059e+37 }
 0x642   : > { %v1008_v51 = vpop.eup %1007 }
 0x643   : > { %v1010_v52 = vpop.eup %1009  ;;  %v708_v53 = vmul.f32 %v1008_v51, %v691_v49  ;;  %vm713_vm11 = vweird.f32 %v1008_v51 }
 0x644   : > { %v693_v54 = vmul.f32 %v1010_v52, %v688_v50  ;;  %vm698_vm12 = vweird.f32 %v1010_v52  ;;  %vm714_vm14 = vmor %vm712_vm13, %vm713_vm11 }
 0x645   : > { %v709_v55 = vsub.f32 1.0, %v708_v53  ;;  %vm699_vm2 = vmor %vm697_vm15, %vm698_vm12 }
 0x646   : > { %v694_v57 = vsub.f32 1.0, %v693_v54 }
 0x647   : > { %v710_v58 = vmul.f32 %v1008_v51, %v709_v55 }
 0x648   : > { %v695_v61 = vmul.f32 %v1010_v52, %v694_v57 }
 0x649   : > { %v711_v63 = vadd.f32 %v1008_v51, %v710_v58 }
 0x64a   : > { %v696_v1 = vadd.f32 %v1010_v52, %v695_v61 }
 0x64b   : > { %v715_v4 = vsel %vm714_vm14, %v1008_v51, %v711_v63 }
 0x64c   : > { %v720_v8 = vsel %vm717_vm1, %v719_v0, %v715_v4  ;;  %v700_v9 = vsel %vm699_vm2, %v1010_v52, %v696_v1 }
 0x64d   : > { %v723_v10 = vmul.f32 %v1239_v7, %v720_v8  ;;  %v705_v11 = vsel %vm702_vm3, %v704_v5, %v700_v9 }
 0x64e   : > { %v722_v12 = vmul.f32 %v1237_v6, %v705_v11 }
 0x64f   : > { %v725_v13 = vsel %vm147_vm0, %v723_v10, 0.0 }
 0x650   : > { %v724_v14 = vsel %vm147_vm0, %v722_v12, 0.0 }
 0x651   : > { %v726_v15 = vadd.f32 %v725_v13, %v724_v14 }
 0x653   : > { %v727_v16 = vrot.slane %v726_v15, 4 }
 0x655   : > { %v728_v17 = vadd.f32 %v727_v16, %v726_v15 }
 0x657   : > { %v729_v18 = vrot.slane %v728_v17, 2 }
 0x659   : > { %v730_v19 = vadd.f32 %v729_v18, %v728_v17 }
 0x65b   : > { %v731_v20 = vrot.slane %v730_v19, 1 }
 0x65d   : > { %v732_v21 = vadd.f32 %v731_v20, %v730_v19 }
 0x65f   : > { %1011 = vrcp.f32 %v732_v21  ;;  %v744_v25 = vand.u32 2147483648, %v732_v21  ;;  %v742_v27 = vand.u32 2147483647, %v732_v21  ;;  %vm738_vm5 = vweird.f32 %v732_v21 }
 0x661   : > { %v745_v29 = vor.u32 1.1754944e-38, %v744_v25  ;;  %vm743_vm7 = vcmp.eq.f32.partialorder %v742_v27, 8.507059e+37 }
 0x665   : > { %v1012_v22 = vpop.eup %1011 }
 0x666   : > { %v734_v23 = vmul.f32 %v1012_v22, %v732_v21  ;;  %vm739_vm4 = vweird.f32 %v1012_v22 }
 0x667   : > { %vm740_vm6 = vmor %vm738_vm5, %vm739_vm4 }
 0x668   : > { %v735_v24 = vsub.f32 1.0, %v734_v23 }
 0x66a   : > { %v736_v26 = vmul.f32 %v1012_v22, %v735_v24 }
 0x66c   : > { %v737_v28 = vadd.f32 %v1012_v22, %v736_v26 }
 0x66e   : > { %v741_v30 = vsel %vm740_vm6, %v1012_v22, %v737_v28 }
 0x66f   : > { %v746_v31 = vsel %vm743_vm7, %v745_v29, %v741_v30 }
 0x670   : > { %v749_v32 = vmul.f32 %v1239_v7, %v746_v31  ;;  %v748_v33 = vmul.f32 %v1237_v6, %v746_v31 }
 0x672   : > { %v753_v34 = vsel %vm147_vm0, %v749_v32, 0.0  ;;  %v750_v35 = vsel %vm147_vm0, %v748_v33, 0.0 }
 0x673   : > { %754 = vadd.xlane.f32.xlu1 %v753_v34  ;;  %751 = vadd.xlane.f32.xlu0 %v750_v35 }
 0x6e6   : > { %v755_v36 = vpop.xlane.xlu1 %754  ;;  %v752_v37 = vpop.xlane.xlu0 %751 }
 0x6e7   : > { %1013 = vrcp.f32 %v755_v36  ;;  %v782_v43 = vand.u32 2147483648, %v755_v36  ;;  %v780_v6 = vand.u32 2147483647, %v755_v36  ;;  %v767_v45 = vand.u32 2147483648, %v752_v37 }
 0x6e8   : > { %1015 = vrcp.f32 %v752_v37  ;;  %v765_v47 = vand.u32 2147483647, %v752_v37  ;;  %vm776_vm10 = vweird.f32 %v755_v36  ;;  %vm761_vm12 = vweird.f32 %v752_v37 }
 0x6e9   : > { %v783_v49 = vor.u32 1.1754944e-38, %v782_v43  ;;  %vm781_vm13 = vcmp.eq.f32.partialorder %v780_v6, 8.507059e+37  ;;  %v768_v52 = vor.u32 1.1754944e-38, %v767_v45  ;;  %1017 = vlog2.f32 %v746_v31 }
 0x6ea   : > { %vm766_vm15 = vcmp.eq.f32.partialorder %v765_v47, 8.507059e+37 }
 0x6ed   : > { %v1014_v38 = vpop.eup %1013 }
 0x6ee   : > { %v1016_v39 = vpop.eup %1015  ;;  %v772_v40 = vmul.f32 %v1014_v38, %v755_v36  ;;  %vm777_vm8 = vweird.f32 %v1014_v38 }
 0x6ef   : > { %v757_v41 = vmul.f32 %v1016_v39, %v752_v37  ;;  %vm762_vm9 = vweird.f32 %v1016_v39  ;;  %vm778_vm11 = vmor %vm776_vm10, %vm777_vm8  ;;  %v1018_v56 = vpop.eup %1017 }
 0x6f0   : > { %v773_v42 = vsub.f32 1.0, %v772_v40  ;;  %vm763_vm14 = vmor %vm761_vm12, %vm762_vm9  ;;  %v793_v61 = vmul.f32 0.6931472, %v1018_v56 }
 0x6f1   : > { %v758_v44 = vsub.f32 1.0, %v757_v41 }
 0x6f2   : > { %v774_v7 = vmul.f32 %v1014_v38, %v773_v42 }
 0x6f3   : > { %v759_v46 = vmul.f32 %v1016_v39, %v758_v44 }
 0x6f4   : > { %v775_v48 = vadd.f32 %v1014_v38, %v774_v7 }
 0x6f5   : > { %v760_v50 = vadd.f32 %v1016_v39, %v759_v46 }
 0x6f6   : > { %v779_v51 = vsel %vm778_vm11, %v1014_v38, %v775_v48 }
 0x6f7   : > { %v784_v53 = vsel %vm781_vm13, %v783_v49, %v779_v51  ;;  %v764_v54 = vsel %vm763_vm14, %v1016_v39, %v760_v50 }
 0x6f8   : > { %1019 = vlog2.f32 %v784_v53  ;;  %v769_v55 = vsel %vm766_vm15, %v768_v52, %v764_v54 }
 0x6f9   : > { %1021 = vlog2.f32 %v769_v55 }
 0x6fe   : > { %v1020_v57 = vpop.eup %1019 }
 0x6ff   : > { %v1022_v58 = vpop.eup %1021  ;;  %v789_v59 = vmul.f32 0.6931472, %v1020_v57 }
 0x700   : > { %v787_v60 = vmul.f32 0.6931472, %v1022_v58 }
 0x701   : > { %v791_v62 = vadd.f32 %v789_v59, %v1233_v3 }
 0x702   : > { %v790_v63 = vadd.f32 %v787_v60, %v1231_v2 }
 0x703   : > { %v795_v0 = vadd.f32 %v793_v61, %v791_v62 }
 0x704   : > { %v794_v1 = vadd.f32 %v793_v61, %v790_v63 }
 0x705   : > { %797 = vst.msk [vmem:[%s136_s28 + $0x8] sm:$0xff] %vm147_vm0, %v795_v0 }
 0x706   : > { %796 = vst.msk [vmem:[%s136_s28] sm:$0xff] %vm147_vm0, %v794_v1 }
 0x707   : > { %1080 = shalt.err (!%p1077_p4)
}
 0x708   : > { %s1123_s16 = smov 128   ;;  %s1124_s20 = smov 8  }
 0x709   : > { %905 = dma.vmem_to_hbm [thread:$0]  (%p1185_p11), %s812_s29, 256, %s814_s30, %s799_s10, %s1123_s16, %s1123_s16, %s1124_s20  }
 0x70a PF: > { %s828_s21 = sand.u32 1, %s1107_s6   ;;  %p1367_p7 = scmp.ge.s32.totalorder %s1119_s9, 2 }
 0x70b   : > { %s829_s22 = scalar_lea.sflag [#allocation4], %s828_s21 }
 0x70c   : > { %p912_p5 = pnand %p1367_p7, %p1189_p12 }
 0x70e   : > { %p913_p8 = pneg %p912_p5 }
 0x710   : > { %1102 = dma.done.wait (%p913_p8), %s829_s22, 256  }
 0x711   : > { %1104 = vsyncadd (%p913_p8), %s829_s22, 4294967040  ;;  %p14_p10 = scmp.ge.s32.totalorder %s1160_s12, 4   ;;  %s1368_s6 = smov %s1111_s7 }
 0x712   : > { %s1369_s7 = smov %s1115_s8  ;;  %s1370_s8 = smov %s1172_s15 }
 0x713   : > { %s1371_s9 = smov %s1160_s12  ;;  %16 = sbr.rel (!%p14_p10) target bundleno = 5 (0x5), region = 69 }
 0x718   :  { %835 = vsyncpa [#allocation3], 1 }
 0x719   :  { %837 = vsyncpa [#allocation3 + $0x1], 1 }
 0x71a   :  { %838 = vsyncpa [#allocation4], 1 }
 0x71b   :  { %840 = vsyncpa [#allocation4 + $0x1], 1 }

</bundles_post_ra>
